<compile_context>
chip_gen: v7x
topology: tpu7x:2x2x1
jax: 0.10.0
libtpu: 0.0.40
codegen_flags: <defaults>
</compile_context>

<pallas_src>
import jax
import jax.numpy as jnp
from jax.experimental import pallas as pl
from jax.experimental.pallas import tpu as pltpu


def _linear_kernel(x_ref, w_ref, b_ref, o_ref):
    """o = x @ w + b for the current (full-K) block. bf16 operands, f32 acc."""
    acc = jnp.dot(
        x_ref[...].astype(jnp.bfloat16),
        w_ref[...],  # already bf16
        preferred_element_type=jnp.float32,
    )
    o_ref[...] = (acc + b_ref[...]).astype(o_ref.dtype)


def _num_tensorcores_per_chip():
    """Best-effort TC-per-chip query; defaults to 1 (v5e/v6e behavior)."""
    try:
        dev = jax.devices()[0]
        n = int(getattr(dev, "num_cores", 1))
        return n if n >= 1 else 1
    except Exception:
        return 1


def linear_pallas(
    x,
    w,
    b,
    *,
    tm=256,
    fast_path_vmem_budget_bytes=40 * 1024 * 1024,
):
    """y = x @ w + b, with x: (M, K) f32, w: (K, N) bf16, b: (N,) f32."""
    M, K = x.shape
    K2, N = w.shape
    assert K == K2 and b.shape == (N,)

    w = w.astype(jnp.bfloat16)
    b2d = b.reshape(1, N).astype(jnp.float32)
    out_shape = jax.ShapeDtypeStruct((M, N), x.dtype)

    x_bytes = x.size * x.dtype.itemsize
    w_bytes = w.size * w.dtype.itemsize        # bf16
    b_bytes = b2d.size * b2d.dtype.itemsize
    o_bytes = M * N * x.dtype.itemsize
    bytes_io = x_bytes + w_bytes + b_bytes + o_bytes
    cost = pl.CostEstimate(
        flops=2 * M * K * N, transcendentals=0, bytes_accessed=bytes_io
    )

    # ---------------- Fast path: everything resident in VMEM ----------------
    if bytes_io <= fast_path_vmem_budget_bytes:
        vmem_limit = int(bytes_io + 4 * 1024 * 1024)  # resident + margin

        n_tc = _num_tensorcores_per_chip()
        half_n = N // 2
        if n_tc > 1 and N % 2 == 0 and half_n % 128 == 0:
            # v7x megacore: split the weight DMA across the two TensorCores
            # with a trivial 2-step "parallel" N grid (tn = 384, lane-dense).
            return pl.pallas_call(
                _linear_kernel,
                out_shape=out_shape,
                grid_spec=pltpu.PrefetchScalarGridSpec(
                    num_scalar_prefetch=0,
                    grid=(2,),
                    in_specs=[
                        pl.BlockSpec((M, K), lambda j: (0, 0)),       # x (full)
                        pl.BlockSpec((K, half_n), lambda j: (0, j)),  # w half
                        pl.BlockSpec((1, half_n), lambda j: (0, j)),  # bias half
                    ],
                    out_specs=pl.BlockSpec((M, half_n), lambda j: (0, j)),
                ),
                compiler_params=pltpu.CompilerParams(
                    dimension_semantics=("parallel",),
                    vmem_limit_bytes=vmem_limit,
                ),
                cost_estimate=cost,
            )(x, w, b2d)

        # Single-TC chips (v5e/v6e): one ungridded call — one weight DMA,
        # one MXU pass, one lane-dense (N = 768 = 6*128) store.
        return pl.pallas_call(
            _linear_kernel,
            out_shape=out_shape,
            in_specs=[
                pl.BlockSpec(memory_space=pltpu.MemorySpace.VMEM),  # x
                pl.BlockSpec(memory_space=pltpu.MemorySpace.VMEM),  # w (bf16)
                pl.BlockSpec(memory_space=pltpu.MemorySpace.VMEM),  # bias
            ],
            out_specs=pl.BlockSpec(memory_space=pltpu.MemorySpace.VMEM),
            compiler_params=pltpu.CompilerParams(
                vmem_limit_bytes=vmem_limit,
            ),
            cost_estimate=cost,
        )(x, w, b2d)

    # ------------- Fallback for large batch: tile over M only ---------------
    # x and out are streamed in (tm, K)/(tm, N) blocks; the bf16 (K, N) weight
    # and the bias stay VMEM-resident across the M axis (index_map -> (0, 0)).
    # Output keeps the full lane-dense N width (unmasked vst). M axis is
    # "parallel" so it can shard across TensorCores on v7x.
    tm = min(tm, ((M + 7) // 8) * 8)  # keep tm a multiple of 8, <= padded M
    grid_m = pl.cdiv(M, tm)
    per_step_bytes = (
        2 * (tm * K * x.dtype.itemsize)     # x blocks, double-buffered
        + 2 * (tm * N * x.dtype.itemsize)   # out blocks, double-buffered
        + 2 * w_bytes                       # resident weight (conservative x2)
        + 2 * b_bytes
    )
    vmem_limit = int(per_step_bytes + 4 * 1024 * 1024)

    return pl.pallas_call(
        _linear_kernel,
        out_shape=out_shape,
        grid_spec=pltpu.PrefetchScalarGridSpec(
            num_scalar_prefetch=0,
            grid=(grid_m,),
            in_specs=[
                pl.BlockSpec((tm, K), lambda i: (i, 0)),  # x: streamed over M
                pl.BlockSpec((K, N), lambda i: (0, 0)),   # weight: resident
                pl.BlockSpec((1, N), lambda i: (0, 0)),   # bias: resident
            ],
            out_specs=pl.BlockSpec((tm, N), lambda i: (i, 0)),
        ),
        compiler_params=pltpu.CompilerParams(
            dimension_semantics=("parallel",),
            vmem_limit_bytes=vmem_limit,
        ),
        cost_estimate=cost,
    )(x, w, b2d)


class TransformationNetPallas:
    """JAX/Pallas equivalent of the PyTorch TransformationNet (single Linear)."""

    def __init__(self, input_size, output_size, key):
        kw, kb = jax.random.split(key)
        # Deterministic init mimicking nn.Linear's uniform(-1/sqrt(fan_in), ...)
        bound = 1.0 / jnp.sqrt(jnp.float32(input_size))
        # Stored transposed relative to PyTorch ((in, out)) and in bf16: this
        # kernel is HBM-bound on the weight read, so halving weight bytes is
        # the single biggest per-call win.
        self.weight_t = jax.random.uniform(
            kw, (input_size, output_size), jnp.float32, -bound, bound
        ).astype(jnp.bfloat16)
        self.bias = jax.random.uniform(
            kb, (output_size,), jnp.float32, -bound, bound
        )

    def __call__(self, x):
        return linear_pallas(x, self.weight_t, self.bias)


if __name__ == "__main__":
    input_size = 768
    output_size = 768
    batch = 8

    key = jax.random.PRNGKey(0)
    k_param, k_x = jax.random.split(key)

    net = TransformationNetPallas(input_size, output_size, k_param)
    x = jax.random.normal(k_x, (batch, input_size), jnp.float32)

    y = net(x)
    y = jax.block_until_ready(y)

    # Sanity check against plain JAX reference (same bf16 weight, f32 math).
    y_ref = x @ net.weight_t.astype(jnp.float32) + net.bias
    assert y.shape == (batch, output_size)
    assert y.dtype == jnp.float32
    # bf16 operands (x cast in-kernel) + f32 accumulation -> ~1e-3 abs error.
    assert jnp.allclose(y, y_ref, atol=1e-2, rtol=1e-2)

    print("KERNEL_OK")
</pallas_src>

<mosaic_0001>
module attributes {stable_mosaic.version = 11 : i64} {
  func.func @_linear_kernel(%arg0: memref<8x768xf32, #tpu.memory_space<vmem>>, %arg1: memref<768x768xbf16, #tpu.memory_space<vmem>>, %arg2: memref<1x768xf32, #tpu.memory_space<vmem>>, %arg3: memref<8x768xf32, #tpu.memory_space<vmem>>) attributes {dimension_semantics = [], scalar_prefetch = 0 : i64, scratch_operands = 0 : i64, tpu.core_type = #tpu.core_type<tc>} {
    %c0 = arith.constant 0 : index
    %c0_0 = arith.constant 0 : index
    %0 = vector.load %arg0[%c0, %c0_0] : memref<8x768xf32, #tpu.memory_space<vmem>>, vector<8x768xf32>
    %1 = arith.truncf %0 : vector<8x768xf32> to vector<8x768xbf16>
    %c0_1 = arith.constant 0 : index
    %c0_2 = arith.constant 0 : index
    %2 = vector.load %arg1[%c0_1, %c0_2] : memref<768x768xbf16, #tpu.memory_space<vmem>>, vector<768x768xbf16>
    %cst = arith.constant dense<0.000000e+00> : vector<8x768xf32>
    %3 = tpu.matmul %1, %2, %cst {dimension_numbers = #tpu.dot_dimension_numbers<[1], [0], [0], [1], [0, 0, 1, 1], [], []>} : vector<8x768xbf16>, vector<768x768xbf16>, vector<8x768xf32> -> vector<8x768xf32>
    %c0_3 = arith.constant 0 : index
    %c0_4 = arith.constant 0 : index
    %4 = vector.load %arg2[%c0_3, %c0_4] : memref<1x768xf32, #tpu.memory_space<vmem>>, vector<1x768xf32>
    %5 = vector.broadcast %4 : vector<1x768xf32> to vector<8x768xf32>
    %6 = arith.addf %3, %5 : vector<8x768xf32>
    %c0_5 = arith.constant 0 : index
    %c0_6 = arith.constant 0 : index
    %7 = vector.load %arg3[%c0_5, %c0_6] : memref<8x768xf32, #tpu.memory_space<vmem>>, vector<8x768xf32>
    tpu.vector_store %arg3[%c0_5, %c0_6], %6 {strides = array<i32>} : memref<8x768xf32, #tpu.memory_space<vmem>>, vector<8x768xf32>,
    return
  }
}

</mosaic_0001>

<bundles_post_ra>
// kernel: tpu_custom_call.1
= control target key start
LH: loop header
LB: loop body
LE: loop exit
PB: predicated region body
PF: predicated region fallthrough
CT: control target
= control target key end

     0   :  { %8 = vsyncpa [#allocation3], 0  ;;  %s3167_s0 = inlined_call_operand.hbm [shape: f32[8,768], index: 0, kind: input, shape index: {}]   ;;  %s3168_s1 = inlined_call_operand.hbm [shape: bf16[768,768], index: 1, kind: input, shape index: {}]   ;;  %s3169_s2 = inlined_call_operand.hbm [shape: f32[1,768], index: 2, kind: input, shape index: {}]   ;;  %s3170_s3 = inlined_call_operand.hbm [shape: f32[8,768], index: 3, kind: output, shape index: {}]  }
   0x1   :  { %9 = vsyncpa [#allocation6], 0 }
   0x2   :  { %10 = vsyncpa [#allocation4], 0  ;;  %s3063_s12 = smov [#allocation5]   ;;  %s2969_s16 = scalar_lea.hbm %s3168_s1, 36864 }
   0x3   :  { %s26_s13 = sshll.u32 %s3063_s12, 4  ;;  %p2970_p0 = scmp.ne.s32.totalorder %s3168_s1, %s2969_s16  ;;  %s27_s13 = int_to_ptr.vmem [resolvable:$true] %s26_s13 }
   0x4   :  { %p2973_p1 = scmp.lt.u32.totalorder %s2969_s16, %s3168_s1 }
   0x6   :  { %p2975_p2 = pnand %p2973_p1, %p2970_p0 }
   0x8   :  { %2978 = shalt.err (!%p2975_p2)
}
   0x9   :  { %s2979_s21 = scalar_lea.vmem %s27_s13, 36864  ;;  %p2984_p4 = scmp.lt.s32.totalorder %s27_s13, %s27_s13 }
   0xa   :  { %p2980_p3 = scmp.ne.s32.totalorder %s27_s13, %s2979_s21  ;;  %p2985_p5 = scmp.lt.s32.totalorder %s2979_s21, %s2979_s21 }
   0xc   :  { %p2986_p6 = por %p2985_p5, %p2984_p4 }
   0xe   :  { %p2987_p7 = pnand %p2986_p6, %p2980_p3 }
  0x10   :  { %2990 = shalt.err (!%p2987_p7)
}
  0x11   :  { %s3064_s22 = smov 384   ;;  %s3065_s23 = smov 24  }
  0x12   :  { %32 = dma.hbm_to_vmem [thread:$0]  %s3168_s1, 36864, %s27_s13, [#allocation6], %s3064_s22, %s3064_s22, %s3065_s23  }
  0x13   :  { %s3066_s26 = smov [#allocation2]   ;;  %s3067_s28 = smov [#allocation7]  }
  0x14   :  { %s17_s27 = sshll.u32 %s3066_s26, 4  ;;  %s39_s29 = sshll.u32 %s3067_s28, 4  ;;  %s18_s27 = int_to_ptr.vmem [resolvable:$true] %s17_s27  ;;  %s40_s29 = int_to_ptr.vmem [resolvable:$true] %s39_s29 }
  0x15   :  { %s2991_s5 = scalar_lea.hbm %s3167_s0, 768 }
  0x16   :  { %p2992_p8 = scmp.ne.s32.totalorder %s3167_s0, %s2991_s5  ;;  %p2995_p9 = scmp.lt.u32.totalorder %s2991_s5, %s3167_s0 }
  0x18   :  { %p2997_p10 = pnand %p2995_p9, %p2992_p8 }
  0x1a   :  { %3000 = shalt.err (!%p2997_p10)
}
  0x1b   :  { %s3001_s1 = scalar_lea.vmem %s18_s27, 768  ;;  %p3006_p12 = scmp.lt.s32.totalorder %s18_s27, %s18_s27 }
  0x1c   :  { %p3002_p11 = scmp.ne.s32.totalorder %s18_s27, %s3001_s1  ;;  %p3007_p13 = scmp.lt.s32.totalorder %s3001_s1, %s3001_s1 }
  0x1e   :  { %p3008_p0 = por %p3007_p13, %p3006_p12 }
  0x20   :  { %p3009_p1 = pnand %p3008_p0, %p3002_p11 }
  0x22   :  { %3012 = shalt.err (!%p3009_p1)
}
  0x23   :  { %20 = dma.hbm_to_vmem [thread:$0]  %s3167_s0, 768, %s18_s27, [#allocation3]  }
  0x24   :  { %s3013_s14 = scalar_lea.hbm %s3169_s2, 96 }
  0x25   :  { %p3014_p2 = scmp.ne.s32.totalorder %s3169_s2, %s3013_s14  ;;  %p3017_p3 = scmp.lt.u32.totalorder %s3013_s14, %s3169_s2 }
  0x27   :  { %p3019_p4 = pnand %p3017_p3, %p3014_p2 }
  0x29   :  { %3022 = shalt.err (!%p3019_p4)
}
  0x2a   :  { %s3023_s19 = scalar_lea.vmem %s40_s29, 96  ;;  %p3028_p6 = scmp.lt.s32.totalorder %s40_s29, %s40_s29 }
  0x2b   :  { %p3024_p5 = scmp.ne.s32.totalorder %s40_s29, %s3023_s19  ;;  %p3029_p7 = scmp.lt.s32.totalorder %s3023_s19, %s3023_s19 }
  0x2d   :  { %p3030_p8 = por %p3029_p7, %p3028_p6 }
  0x2f   :  { %p3031_p9 = pnand %p3030_p8, %p3024_p5 }
  0x31   :  { %3034 = shalt.err (!%p3031_p9)
}
  0x32   :  { %42 = dma.hbm_to_vmem [thread:$0]  %s3169_s2, 96, %s40_s29, [#allocation6]  }
  0x33   :  { %3057 = dma.done.wait [#allocation3], 768  }
  0x34   :  { %3058 = vsyncadd [#allocation3], 4294966528 }
  0x35   :  { %3059 = dma.done.wait [#allocation6], 36960  }
  0x36   :  { %3060 = vsyncadd [#allocation6], 4294930336  ;;  %v2537_v0 = vld [vmem:[#allocation5 + $0x4] ss:$24 sps:$4 sm:$0xff]   ;;  %v2541_v2 = vld [vmem:[#allocation5] ss:$24 sps:$4 sm:$0xff]  }
  0x37   :  { %v2539_v1 = vld [vmem:[#allocation5 + $0x304] ss:$24 sps:$4 sm:$0xff]   ;;  %1824 = vmatprep.subr.bf16.mxu1 %v2537_v0  ;;  %v2542_v3 = vld [vmem:[#allocation5 + $0x300] ss:$24 sps:$4 sm:$0xff]   ;;  %v2543_v4 = vld [vmem:[#allocation5 + $0x34] ss:$24 sps:$4 sm:$0xff]  }
  0x38   :  { %1865 = vmatprep.subr.bf16.mxu0 %v2539_v1  ;;  %1825 = vmatpush1.bf16.msra.mxu1 %v2541_v2  ;;  %v2545_v5 = vld [vmem:[#allocation5 + $0x334] ss:$24 sps:$4 sm:$0xff]   ;;  %v2547_v6 = vld [vmem:[#allocation5 + $0x30] ss:$24 sps:$4 sm:$0xff]   ;;  %v2549_v8 = vld [vmem:[#allocation5 + $0x64] ss:$24 sps:$4 sm:$0xff]  }
  0x39   :  { %1866 = vmatpush1.bf16.msra.mxu0 %v2542_v3  ;;  %1826 = vmatprep.subr.bf16.mxu1 %v2543_v4  ;;  %v2548_v7 = vld [vmem:[#allocation5 + $0x330] ss:$24 sps:$4 sm:$0xff]   ;;  %v2551_v9 = vld [vmem:[#allocation5 + $0x364] ss:$24 sps:$4 sm:$0xff]   ;;  %v2553_v10 = vld [vmem:[#allocation5 + $0x60] ss:$24 sps:$4 sm:$0xff]  }
  0x3a   :  { %1867 = vmatprep.subr.bf16.mxu0 %v2545_v5  ;;  %v2554_v11 = vld [vmem:[#allocation5 + $0x360] ss:$24 sps:$4 sm:$0xff]   ;;  %v2555_v12 = vld [vmem:[#allocation5 + $0x94] ss:$24 sps:$4 sm:$0xff]   ;;  %v2559_v14 = vld [vmem:[#allocation5 + $0x90] ss:$24 sps:$4 sm:$0xff]  }
  0x3b   :  { %v2557_v13 = vld [vmem:[#allocation5 + $0x394] ss:$24 sps:$4 sm:$0xff]   ;;  %v2560_v15 = vld [vmem:[#allocation5 + $0x390] ss:$24 sps:$4 sm:$0xff]   ;;  %v2561_v16 = vld [vmem:[#allocation5 + $0xc4] ss:$24 sps:$4 sm:$0xff]  }
  0x3c   :  { %1827 = vmatpush1.bf16.msra.mxu1 %v2547_v6  ;;  %v2563_v17 = vld [vmem:[#allocation5 + $0x3c4] ss:$24 sps:$4 sm:$0xff]   ;;  %v2565_v18 = vld [vmem:[#allocation5 + $0xc0] ss:$24 sps:$4 sm:$0xff]   ;;  %v2567_v20 = vld [vmem:[#allocation5 + $0xf4] ss:$24 sps:$4 sm:$0xff]  }
  0x3d   :  { %1868 = vmatpush1.bf16.msra.mxu0 %v2548_v7  ;;  %1828 = vmatprep.subr.bf16.mxu1 %v2549_v8  ;;  %v2566_v19 = vld [vmem:[#allocation5 + $0x3c0] ss:$24 sps:$4 sm:$0xff]   ;;  %v2569_v21 = vld [vmem:[#allocation5 + $0x3f4] ss:$24 sps:$4 sm:$0xff]   ;;  %v2571_v22 = vld [vmem:[#allocation5 + $0xf0] ss:$24 sps:$4 sm:$0xff]  }
  0x3e   :  { %1869 = vmatprep.subr.bf16.mxu0 %v2551_v9  ;;  %v2572_v23 = vld [vmem:[#allocation5 + $0x3f0] ss:$24 sps:$4 sm:$0xff]   ;;  %v2573_v24 = vld [vmem:[#allocation5 + $0x124] ss:$24 sps:$4 sm:$0xff]   ;;  %v2577_v26 = vld [vmem:[#allocation5 + $0x120] ss:$24 sps:$4 sm:$0xff]  }
  0x3f   :  { %v2575_v25 = vld [vmem:[#allocation5 + $0x424] ss:$24 sps:$4 sm:$0xff]   ;;  %v2578_v27 = vld [vmem:[#allocation5 + $0x420] ss:$24 sps:$4 sm:$0xff]   ;;  %v2579_v28 = vld [vmem:[#allocation5 + $0x154] ss:$24 sps:$4 sm:$0xff]  }
  0x40   :  { %1829 = vmatpush1.bf16.msra.mxu1 %v2553_v10  ;;  %v2581_v29 = vld [vmem:[#allocation5 + $0x454] ss:$24 sps:$4 sm:$0xff]   ;;  %v2583_v30 = vld [vmem:[#allocation5 + $0x150] ss:$24 sps:$4 sm:$0xff]   ;;  %v2585_v32 = vld [vmem:[#allocation5 + $0x184] ss:$24 sps:$4 sm:$0xff]  }
  0x41   :  { %1870 = vmatpush1.bf16.msra.mxu0 %v2554_v11  ;;  %1830 = vmatprep.subr.bf16.mxu1 %v2555_v12  ;;  %v2584_v31 = vld [vmem:[#allocation5 + $0x450] ss:$24 sps:$4 sm:$0xff]   ;;  %v2587_v33 = vld [vmem:[#allocation5 + $0x484] ss:$24 sps:$4 sm:$0xff]   ;;  %v2589_v34 = vld [vmem:[#allocation5 + $0x180] ss:$24 sps:$4 sm:$0xff]  }
  0x42   :  { %1871 = vmatprep.subr.bf16.mxu0 %v2557_v13  ;;  %v2590_v35 = vld [vmem:[#allocation5 + $0x480] ss:$24 sps:$4 sm:$0xff]   ;;  %v2591_v36 = vld [vmem:[#allocation5 + $0x1b4] ss:$24 sps:$4 sm:$0xff]   ;;  %v2595_v38 = vld [vmem:[#allocation5 + $0x1b0] ss:$24 sps:$4 sm:$0xff]  }
  0x43   :  { %v2593_v37 = vld [vmem:[#allocation5 + $0x4b4] ss:$24 sps:$4 sm:$0xff]   ;;  %v2596_v39 = vld [vmem:[#allocation5 + $0x4b0] ss:$24 sps:$4 sm:$0xff]   ;;  %v2597_v40 = vld [vmem:[#allocation5 + $0x1e4] ss:$24 sps:$4 sm:$0xff]  }
  0x44   :  { %1831 = vmatpush1.bf16.msra.mxu1 %v2559_v14  ;;  %v2599_v41 = vld [vmem:[#allocation5 + $0x4e4] ss:$24 sps:$4 sm:$0xff]   ;;  %v2601_v42 = vld [vmem:[#allocation5 + $0x1e0] ss:$24 sps:$4 sm:$0xff]   ;;  %v2603_v44 = vld [vmem:[#allocation5 + $0x214] ss:$24 sps:$4 sm:$0xff]  }
  0x45   :  { %1872 = vmatpush1.bf16.msra.mxu0 %v2560_v15  ;;  %1832 = vmatprep.subr.bf16.mxu1 %v2561_v16  ;;  %v2602_v43 = vld [vmem:[#allocation5 + $0x4e0] ss:$24 sps:$4 sm:$0xff]   ;;  %v2605_v45 = vld [vmem:[#allocation5 + $0x514] ss:$24 sps:$4 sm:$0xff]   ;;  %v2607_v49 = vld [vmem:[#allocation5 + $0x210] ss:$24 sps:$4 sm:$0xff]  }
  0x46   :  { %1873 = vmatprep.subr.bf16.mxu0 %v2563_v17  ;;  %v53_v46 = vld [vmem:[#allocation2 + $0x8] sm:$0xff]  ;;  %v55_v48 = vld [vmem:[#allocation2 + $0x18] sm:$0xff]  ;;  %v52_v5 = vld [vmem:[#allocation2] sm:$0xff]  ;;  %s3068_s2 = smov [#allocation8]  }
  0x47   :  { %v3125_v47 = vpack.c.bf16 %v53_v46, %v53_v46  ;;  %v2608_v50 = vld [vmem:[#allocation5 + $0x510] ss:$24 sps:$4 sm:$0xff]   ;;  %v3127_v51 = vpack.c.bf16 %v55_v48, %v55_v48  ;;  %v2609_v52 = vld [vmem:[#allocation5 + $0x244] ss:$24 sps:$4 sm:$0xff]   ;;  %v2613_v54 = vld [vmem:[#allocation5 + $0x240] ss:$24 sps:$4 sm:$0xff]   ;;  %v3131_v10 = vpack.c.bf16 %v52_v5, %v52_v5 }
  0x48   :  { %1833 = vmatpush1.bf16.msra.mxu1 %v2565_v18  ;;  %v2611_v53 = vld [vmem:[#allocation5 + $0x544] ss:$24 sps:$4 sm:$0xff]   ;;  %v2614_v55 = vld [vmem:[#allocation5 + $0x540] ss:$24 sps:$4 sm:$0xff]   ;;  %v2615_v56 = vld [vmem:[#allocation5 + $0x274] ss:$24 sps:$4 sm:$0xff]  }
  0x49   :  { %1874 = vmatpush1.bf16.msra.mxu0 %v2566_v19  ;;  %1834 = vmatprep.subr.bf16.mxu1 %v2567_v20  ;;  %v2617_v57 = vld [vmem:[#allocation5 + $0x574] ss:$24 sps:$4 sm:$0xff]   ;;  %v2619_v58 = vld [vmem:[#allocation5 + $0x270] ss:$24 sps:$4 sm:$0xff]   ;;  %v2621_v60 = vld [vmem:[#allocation5 + $0x2a4] ss:$24 sps:$4 sm:$0xff]  }
  0x4a   :  { %1875 = vmatprep.subr.bf16.mxu0 %v2569_v21  ;;  %1856 = vmatprep.mubr.bf16.mxu1 %v3125_v47  ;;  %v2620_v59 = vld [vmem:[#allocation5 + $0x570] ss:$24 sps:$4 sm:$0xff]   ;;  %v2623_v61 = vld [vmem:[#allocation5 + $0x5a4] ss:$24 sps:$4 sm:$0xff]   ;;  %v2625_v62 = vld [vmem:[#allocation5 + $0x2a0] ss:$24 sps:$4 sm:$0xff]  }
  0x4b   :  { %1897 = vmatprep.mubr.bf16.mxu0 %v3127_v51  ;;  %v2626_v63 = vld [vmem:[#allocation5 + $0x5a0] ss:$24 sps:$4 sm:$0xff]   ;;  %v2627_v0 = vld [vmem:[#allocation5 + $0x2d4] ss:$24 sps:$4 sm:$0xff]   ;;  %v2631_v2 = vld [vmem:[#allocation5 + $0x2d0] ss:$24 sps:$4 sm:$0xff]  }
  0x4c   :  { %1835 = vmatpush1.bf16.msra.mxu1 %v2571_v22  ;;  %v2629_v1 = vld [vmem:[#allocation5 + $0x5d4] ss:$24 sps:$4 sm:$0xff]   ;;  %v2632_v3 = vld [vmem:[#allocation5 + $0x5d0] ss:$24 sps:$4 sm:$0xff]   ;;  %v2635_v4 = vld [vmem:[#allocation5 + $0x604] ss:$24 sps:$4 sm:$0xff]  }
  0x4d   :  { %1876 = vmatpush1.bf16.msra.mxu0 %v2572_v23  ;;  %1836 = vmatprep.subr.bf16.mxu1 %v2573_v24  ;;  %v54_v6 = vld [vmem:[#allocation2 + $0x10] sm:$0xff]  ;;  %v2641_v12 = vld [vmem:[#allocation5 + $0x634] ss:$24 sps:$4 sm:$0xff]   ;;  %v2639_v14 = vld [vmem:[#allocation5 + $0x630] ss:$24 sps:$4 sm:$0xff]   ;;  %s2205_s21 = sshll.u32 %s3068_s2, 4  ;;  %s2206_s21 = int_to_ptr.vmem [resolvable:$true] %s2205_s21 }
  0x4e   :  { %1877 = vmatprep.subr.bf16.mxu0 %v2575_v25  ;;  %v2638_v7 = vld [vmem:[#allocation5 + $0xc] ss:$24 sps:$4 sm:$0xff]   ;;  %v2633_v8 = vld [vmem:[#allocation5 + $0x600] ss:$24 sps:$4 sm:$0xff]   ;;  %v3133_v11 = vpack.c.bf16 %v54_v6, %v54_v6  ;;  %v2644_v13 = vld [vmem:[#allocation5 + $0x3c] ss:$24 sps:$4 sm:$0xff]   ;;  %p3040_p11 = scmp.lt.s32.totalorder %s2206_s21, %s2206_s21 }
  0x4f   :  { %v2636_v9 = vld [vmem:[#allocation5 + $0x8] ss:$24 sps:$4 sm:$0xff]   ;;  %v2642_v15 = vld [vmem:[#allocation5 + $0x38] ss:$24 sps:$4 sm:$0xff]   ;;  %v2647_v16 = vld [vmem:[#allocation5 + $0x664] ss:$24 sps:$4 sm:$0xff]  }
  0x50   :  { %1837 = vmatpush1.bf16.msra.mxu1 %v2577_v26  ;;  %v2650_v17 = vld [vmem:[#allocation5 + $0x6c] ss:$24 sps:$4 sm:$0xff]   ;;  %v2645_v18 = vld [vmem:[#allocation5 + $0x660] ss:$24 sps:$4 sm:$0xff]   ;;  %v2656_v21 = vld [vmem:[#allocation5 + $0x9c] ss:$24 sps:$4 sm:$0xff]  }
  0x51   :  { %1878 = vmatpush1.bf16.msra.mxu0 %v2578_v27  ;;  %1838 = vmatprep.subr.bf16.mxu1 %v2579_v28  ;;  %v2648_v19 = vld [vmem:[#allocation5 + $0x68] ss:$24 sps:$4 sm:$0xff]   ;;  %v2653_v20 = vld [vmem:[#allocation5 + $0x694] ss:$24 sps:$4 sm:$0xff]   ;;  %v2654_v23 = vld [vmem:[#allocation5 + $0x98] ss:$24 sps:$4 sm:$0xff]  }
  0x52   :  { %1879 = vmatprep.subr.bf16.mxu0 %v2581_v29  ;;  %v2651_v22 = vld [vmem:[#allocation5 + $0x690] ss:$24 sps:$4 sm:$0xff]   ;;  %v2659_v24 = vld [vmem:[#allocation5 + $0x6c4] ss:$24 sps:$4 sm:$0xff]   ;;  %v2657_v26 = vld [vmem:[#allocation5 + $0x6c0] ss:$24 sps:$4 sm:$0xff]  }
  0x53   :  { %v2662_v25 = vld [vmem:[#allocation5 + $0xcc] ss:$24 sps:$4 sm:$0xff]   ;;  %v2660_v27 = vld [vmem:[#allocation5 + $0xc8] ss:$24 sps:$4 sm:$0xff]   ;;  %v2668_v29 = vld [vmem:[#allocation5 + $0xfc] ss:$24 sps:$4 sm:$0xff]  }
  0x54   :  { %1839 = vmatpush1.bf16.msra.mxu1 %v2583_v30  ;;  %v2665_v28 = vld [vmem:[#allocation5 + $0x6f4] ss:$24 sps:$4 sm:$0xff]   ;;  %v2663_v30 = vld [vmem:[#allocation5 + $0x6f0] ss:$24 sps:$4 sm:$0xff]   ;;  %v2717_v6 = vld [vmem:[#allocation5 + $0x8a0] ss:$24 sps:$4 sm:$0xff]  }
  0x55   :  { %1880 = vmatpush1.bf16.msra.mxu0 %v2584_v31  ;;  %1840 = vmatprep.subr.bf16.mxu1 %v2585_v32  ;;  %v2666_v31 = vld [vmem:[#allocation5 + $0xf8] ss:$24 sps:$4 sm:$0xff]   ;;  %v2671_v32 = vld [vmem:[#allocation5 + $0x724] ss:$24 sps:$4 sm:$0xff]   ;;  %v2689_v46 = vld [vmem:[#allocation5 + $0x7b4] ss:$24 sps:$4 sm:$0xff]  }
  0x56   :  { %1881 = vmatprep.subr.bf16.mxu0 %v2587_v33  ;;  %v2674_v33 = vld [vmem:[#allocation5 + $0x12c] ss:$24 sps:$4 sm:$0xff]   ;;  %v2692_v48 = vld [vmem:[#allocation5 + $0x1bc] ss:$24 sps:$4 sm:$0xff]   ;;  %s3035_s22 = scalar_lea.vmem %s2206_s21, 768 }
  0x57   :  { %v2722_v5 = vld [vmem:[#allocation5 + $0x2ac] ss:$24 sps:$4 sm:$0xff]   ;;  %p3036_p10 = scmp.ne.s32.totalorder %s2206_s21, %s3035_s22  ;;  %p3041_p12 = scmp.lt.s32.totalorder %s3035_s22, %s3035_s22 }
  0x58   :  { %1841 = vmatpush1.bf16.msra.mxu1 %v2589_v34  ;;  %v57_v34 = vld [vmem:[#allocation2 + $0x28] sm:$0xff] }
  0x59   :  { %1882 = vmatpush1.bf16.msra.mxu0 %v2590_v35  ;;  %1842 = vmatprep.subr.bf16.mxu1 %v2591_v36  ;;  %v3138_v35 = vpack.c.bf16 %v57_v34, %v57_v34  ;;  %v2669_v36 = vld [vmem:[#allocation5 + $0x720] ss:$24 sps:$4 sm:$0xff]   ;;  %p3042_p13 = por %p3041_p12, %p3040_p11 }
  0x5a   :  { %1883 = vmatprep.subr.bf16.mxu0 %v2593_v37  ;;  %v2672_v37 = vld [vmem:[#allocation5 + $0x128] ss:$24 sps:$4 sm:$0xff]  }
  0x5b   :  { %v2753_v34 = vld [vmem:[#allocation5 + $0x3c8] ss:$24 sps:$4 sm:$0xff]   ;;  %p3043_p0 = pnand %p3042_p13, %p3036_p10 }
  0x5c   :  { %1843 = vmatpush1.bf16.msra.mxu1 %v2595_v38  ;;  %v2677_v38 = vld [vmem:[#allocation5 + $0x754] ss:$24 sps:$4 sm:$0xff]  }
  0x5d   :  { %1884 = vmatpush1.bf16.msra.mxu0 %v2596_v39  ;;  %1844 = vmatprep.subr.bf16.mxu1 %v2597_v40  ;;  %v2680_v39 = vld [vmem:[#allocation5 + $0x15c] ss:$24 sps:$4 sm:$0xff]   ;;  %v2675_v40 = vld [vmem:[#allocation5 + $0x750] ss:$24 sps:$4 sm:$0xff]  }
  0x5e   :  { %1885 = vmatprep.subr.bf16.mxu0 %v2599_v41  ;;  %v2678_v41 = vld [vmem:[#allocation5 + $0x158] ss:$24 sps:$4 sm:$0xff]  }
  0x60   :  { %1845 = vmatpush1.bf16.msra.mxu1 %v2601_v42  ;;  %v2683_v42 = vld [vmem:[#allocation5 + $0x784] ss:$24 sps:$4 sm:$0xff]  }
  0x61   :  { %1886 = vmatpush1.bf16.msra.mxu0 %v2602_v43  ;;  %1846 = vmatprep.subr.bf16.mxu1 %v2603_v44  ;;  %v2686_v43 = vld [vmem:[#allocation5 + $0x18c] ss:$24 sps:$4 sm:$0xff]   ;;  %v2681_v44 = vld [vmem:[#allocation5 + $0x780] ss:$24 sps:$4 sm:$0xff]  }
  0x62   :  { %1887 = vmatprep.subr.bf16.mxu0 %v2605_v45  ;;  %v2684_v45 = vld [vmem:[#allocation5 + $0x188] ss:$24 sps:$4 sm:$0xff]  }
  0x64   :  { %1847 = vmatpush1.bf16.msra.mxu1 %v2607_v49  ;;  %v2687_v49 = vld [vmem:[#allocation5 + $0x7b0] ss:$24 sps:$4 sm:$0xff]  }
  0x65   :  { %1888 = vmatpush1.bf16.msra.mxu0 %v2608_v50  ;;  %1848 = vmatprep.subr.bf16.mxu1 %v2609_v52  ;;  %v2690_v50 = vld [vmem:[#allocation5 + $0x1b8] ss:$24 sps:$4 sm:$0xff]   ;;  %v2695_v52 = vld [vmem:[#allocation5 + $0x7e4] ss:$24 sps:$4 sm:$0xff]  }
  0x66   :  { %1889 = vmatprep.subr.bf16.mxu0 %v2611_v53  ;;  %v2698_v53 = vld [vmem:[#allocation5 + $0x1ec] ss:$24 sps:$4 sm:$0xff]  }
  0x68   :  { %1849 = vmatpush1.bf16.msra.mxu1 %v2613_v54  ;;  %v2693_v54 = vld [vmem:[#allocation5 + $0x7e0] ss:$24 sps:$4 sm:$0xff]  }
  0x69   :  { %1890 = vmatpush1.bf16.msra.mxu0 %v2614_v55  ;;  %1850 = vmatprep.subr.bf16.mxu1 %v2615_v56  ;;  %v2696_v55 = vld [vmem:[#allocation5 + $0x1e8] ss:$24 sps:$4 sm:$0xff]   ;;  %v2701_v56 = vld [vmem:[#allocation5 + $0x814] ss:$24 sps:$4 sm:$0xff]  }
  0x6a   :  { %1891 = vmatprep.subr.bf16.mxu0 %v2617_v57  ;;  %v2704_v57 = vld [vmem:[#allocation5 + $0x21c] ss:$24 sps:$4 sm:$0xff]  }
  0x6c   :  { %1851 = vmatpush1.bf16.msra.mxu1 %v2619_v58  ;;  %v2699_v58 = vld [vmem:[#allocation5 + $0x810] ss:$24 sps:$4 sm:$0xff]  }
  0x6d   :  { %1892 = vmatpush1.bf16.msra.mxu0 %v2620_v59  ;;  %1852 = vmatprep.subr.bf16.mxu1 %v2621_v60  ;;  %v2702_v59 = vld [vmem:[#allocation5 + $0x218] ss:$24 sps:$4 sm:$0xff]   ;;  %v2707_v60 = vld [vmem:[#allocation5 + $0x844] ss:$24 sps:$4 sm:$0xff]  }
  0x6e   :  { %1893 = vmatprep.subr.bf16.mxu0 %v2623_v61  ;;  %v2710_v61 = vld [vmem:[#allocation5 + $0x24c] ss:$24 sps:$4 sm:$0xff]  }
  0x70   :  { %1853 = vmatpush1.bf16.msra.mxu1 %v2625_v62  ;;  %v2705_v62 = vld [vmem:[#allocation5 + $0x840] ss:$24 sps:$4 sm:$0xff]  }
  0x71   :  { %1894 = vmatpush1.bf16.msra.mxu0 %v2626_v63  ;;  %1854 = vmatprep.subr.bf16.mxu1 %v2627_v0  ;;  %v2708_v63 = vld [vmem:[#allocation5 + $0x248] ss:$24 sps:$4 sm:$0xff]   ;;  %v2713_v0 = vld [vmem:[#allocation5 + $0x874] ss:$24 sps:$4 sm:$0xff]  }
  0x72   :  { %1895 = vmatprep.subr.bf16.mxu0 %v2629_v1  ;;  %v2716_v1 = vld [vmem:[#allocation5 + $0x27c] ss:$24 sps:$4 sm:$0xff]  }
  0x74   :  { %1855 = vmatpush1.bf16.msra.mxu1 %v2631_v2  ;;  %v2711_v2 = vld [vmem:[#allocation5 + $0x870] ss:$24 sps:$4 sm:$0xff]  }
  0x75   :  { %1896 = vmatpush1.bf16.msra.mxu0 %v2632_v3  ;;  %1947 = vmatprep.subr.bf16.mxu1 %v2638_v7  ;;  %v2714_v3 = vld [vmem:[#allocation5 + $0x278] ss:$24 sps:$4 sm:$0xff]   ;;  %v2720_v7 = vld [vmem:[#allocation5 + $0x2a8] ss:$24 sps:$4 sm:$0xff]  }
  0x76   :  { %1906 = vmatprep.subr.bf16.mxu0 %v2635_v4  ;;  %v2719_v4 = vld [vmem:[#allocation5 + $0x8a4] ss:$24 sps:$4 sm:$0xff]  }
  0x77   :  { %1857 = vmatmul.mubr.bf16.vlgmr.msra.gmra.mrb[0].mxu1 %v3131_v10 }
  0x78   :  { %1898 = vmatmul.mubr.bf16.vlgmr.msra.gmra.mrb[0].mxu0 %v3133_v11  ;;  %1948 = vmatpush1.bf16.msra.mxu1 %v2636_v9  ;;  %v2728_v9 = vld [vmem:[#allocation5 + $0x2dc] ss:$24 sps:$4 sm:$0xff]  }
  0x79   :  { %1907 = vmatpush1.bf16.msra.mxu0 %v2633_v8  ;;  %1949 = vmatprep.subr.bf16.mxu1 %v2644_v13  ;;  %v2725_v8 = vld [vmem:[#allocation5 + $0x8d4] ss:$24 sps:$4 sm:$0xff]   ;;  %v2726_v13 = vld [vmem:[#allocation5 + $0x2d8] ss:$24 sps:$4 sm:$0xff]  }
  0x7a   :  { %1908 = vmatprep.subr.bf16.mxu0 %v2641_v12  ;;  %1979 = vmatprep.mubr.bf16.mxu1 %v3125_v47  ;;  %v2723_v12 = vld [vmem:[#allocation5 + $0x8d0] ss:$24 sps:$4 sm:$0xff]  }
  0x7b   :  { %1938 = vmatprep.mubr.bf16.mxu0 %v3138_v35 }
  0x7c   :  { %1950 = vmatpush1.bf16.msra.mxu1 %v2642_v15  ;;  %v2731_v15 = vld [vmem:[#allocation5 + $0x30c] ss:$24 sps:$4 sm:$0xff]  }
  0x7d   :  { %1909 = vmatpush1.bf16.msra.mxu0 %v2639_v14  ;;  %1951 = vmatprep.subr.bf16.mxu1 %v2650_v17  ;;  %v56_v14 = vld [vmem:[#allocation2 + $0x20] sm:$0xff] }
  0x7e   :  { %1910 = vmatprep.subr.bf16.mxu0 %v2647_v16  ;;  %v2734_v16 = vld [vmem:[#allocation5 + $0x14] ss:$24 sps:$4 sm:$0xff]   ;;  %v3141_v17 = vpack.c.bf16 %v56_v14, %v56_v14  ;;  %v2813_v14 = vld [vmem:[#allocation5 + $0x5a8] ss:$24 sps:$4 sm:$0xff]  }
  0x80   :  { %1952 = vmatpush1.bf16.msra.mxu1 %v2648_v19  ;;  %v2732_v19 = vld [vmem:[#allocation5 + $0x10] ss:$24 sps:$4 sm:$0xff]  }
  0x81   :  { %1911 = vmatpush1.bf16.msra.mxu0 %v2645_v18  ;;  %1953 = vmatprep.subr.bf16.mxu1 %v2656_v21  ;;  %v2729_v18 = vld [vmem:[#allocation5 + $0x308] ss:$24 sps:$4 sm:$0xff]   ;;  %v2740_v21 = vld [vmem:[#allocation5 + $0x44] ss:$24 sps:$4 sm:$0xff]  }
  0x82   :  { %1912 = vmatprep.subr.bf16.mxu0 %v2653_v20  ;;  %v2737_v20 = vld [vmem:[#allocation5 + $0x33c] ss:$24 sps:$4 sm:$0xff]  }
  0x84   :  { %1954 = vmatpush1.bf16.msra.mxu1 %v2654_v23  ;;  %v2738_v23 = vld [vmem:[#allocation5 + $0x40] ss:$24 sps:$4 sm:$0xff]  }
  0x85   :  { %1913 = vmatpush1.bf16.msra.mxu0 %v2651_v22  ;;  %1955 = vmatprep.subr.bf16.mxu1 %v2662_v25  ;;  %v2735_v22 = vld [vmem:[#allocation5 + $0x338] ss:$24 sps:$4 sm:$0xff]   ;;  %v2746_v25 = vld [vmem:[#allocation5 + $0x74] ss:$24 sps:$4 sm:$0xff]  }
  0x86   :  { %1914 = vmatprep.subr.bf16.mxu0 %v2659_v24  ;;  %v2743_v24 = vld [vmem:[#allocation5 + $0x36c] ss:$24 sps:$4 sm:$0xff]  }
  0x88   :  { %1956 = vmatpush1.bf16.msra.mxu1 %v2660_v27  ;;  %v2744_v27 = vld [vmem:[#allocation5 + $0x70] ss:$24 sps:$4 sm:$0xff]  }
  0x89   :  { %1915 = vmatpush1.bf16.msra.mxu0 %v2657_v26  ;;  %1957 = vmatprep.subr.bf16.mxu1 %v2668_v29  ;;  %v2741_v26 = vld [vmem:[#allocation5 + $0x368] ss:$24 sps:$4 sm:$0xff]   ;;  %v2752_v29 = vld [vmem:[#allocation5 + $0xa4] ss:$24 sps:$4 sm:$0xff]  }
  0x8a   :  { %1916 = vmatprep.subr.bf16.mxu0 %v2665_v28  ;;  %v2749_v28 = vld [vmem:[#allocation5 + $0x39c] ss:$24 sps:$4 sm:$0xff]  }
  0x8c   :  { %1958 = vmatpush1.bf16.msra.mxu1 %v2666_v31  ;;  %v2750_v31 = vld [vmem:[#allocation5 + $0xa0] ss:$24 sps:$4 sm:$0xff]  }
  0x8d   :  { %1917 = vmatpush1.bf16.msra.mxu0 %v2663_v30  ;;  %1959 = vmatprep.subr.bf16.mxu1 %v2674_v33  ;;  %v2747_v30 = vld [vmem:[#allocation5 + $0x398] ss:$24 sps:$4 sm:$0xff]   ;;  %v2758_v33 = vld [vmem:[#allocation5 + $0xd4] ss:$24 sps:$4 sm:$0xff]  }
  0x8e   :  { %1918 = vmatprep.subr.bf16.mxu0 %v2671_v32  ;;  %v2755_v32 = vld [vmem:[#allocation5 + $0x3cc] ss:$24 sps:$4 sm:$0xff]  }
  0x90   :  { %1960 = vmatpush1.bf16.msra.mxu1 %v2672_v37  ;;  %v2764_v37 = vld [vmem:[#allocation5 + $0x104] ss:$24 sps:$4 sm:$0xff]  }
  0x91   :  { %1919 = vmatpush1.bf16.msra.mxu0 %v2669_v36  ;;  %1961 = vmatprep.subr.bf16.mxu1 %v2680_v39  ;;  %v2761_v36 = vld [vmem:[#allocation5 + $0x3fc] ss:$24 sps:$4 sm:$0xff]   ;;  %v2762_v39 = vld [vmem:[#allocation5 + $0x100] ss:$24 sps:$4 sm:$0xff]  }
  0x92   :  { %1920 = vmatprep.subr.bf16.mxu0 %v2677_v38  ;;  %v2759_v38 = vld [vmem:[#allocation5 + $0x3f8] ss:$24 sps:$4 sm:$0xff]  }
  0x94   :  { %1962 = vmatpush1.bf16.msra.mxu1 %v2678_v41  ;;  %v2770_v41 = vld [vmem:[#allocation5 + $0x134] ss:$24 sps:$4 sm:$0xff]  }
  0x95   :  { %1921 = vmatpush1.bf16.msra.mxu0 %v2675_v40  ;;  %1963 = vmatprep.subr.bf16.mxu1 %v2686_v43  ;;  %v2767_v40 = vld [vmem:[#allocation5 + $0x42c] ss:$24 sps:$4 sm:$0xff]   ;;  %v2768_v43 = vld [vmem:[#allocation5 + $0x130] ss:$24 sps:$4 sm:$0xff]  }
  0x96   :  { %1922 = vmatprep.subr.bf16.mxu0 %v2683_v42  ;;  %v2765_v42 = vld [vmem:[#allocation5 + $0x428] ss:$24 sps:$4 sm:$0xff]  }
  0x98   :  { %1964 = vmatpush1.bf16.msra.mxu1 %v2684_v45  ;;  %v2776_v45 = vld [vmem:[#allocation5 + $0x164] ss:$24 sps:$4 sm:$0xff]  }
  0x99   :  { %1923 = vmatpush1.bf16.msra.mxu0 %v2681_v44  ;;  %1965 = vmatprep.subr.bf16.mxu1 %v2692_v48  ;;  %v2773_v44 = vld [vmem:[#allocation5 + $0x45c] ss:$24 sps:$4 sm:$0xff]   ;;  %v2774_v48 = vld [vmem:[#allocation5 + $0x160] ss:$24 sps:$4 sm:$0xff]  }
  0x9a   :  { %1924 = vmatprep.subr.bf16.mxu0 %v2689_v46  ;;  %v2771_v46 = vld [vmem:[#allocation5 + $0x458] ss:$24 sps:$4 sm:$0xff]  }
  0x9c   :  { %1966 = vmatpush1.bf16.msra.mxu1 %v2690_v50  ;;  %v2782_v50 = vld [vmem:[#allocation5 + $0x194] ss:$24 sps:$4 sm:$0xff]  }
  0x9d   :  { %1925 = vmatpush1.bf16.msra.mxu0 %v2687_v49  ;;  %1967 = vmatprep.subr.bf16.mxu1 %v2698_v53  ;;  %v2779_v49 = vld [vmem:[#allocation5 + $0x48c] ss:$24 sps:$4 sm:$0xff]   ;;  %v2780_v53 = vld [vmem:[#allocation5 + $0x190] ss:$24 sps:$4 sm:$0xff]  }
  0x9e   :  { %1926 = vmatprep.subr.bf16.mxu0 %v2695_v52  ;;  %v2777_v52 = vld [vmem:[#allocation5 + $0x488] ss:$24 sps:$4 sm:$0xff]  }
  0xa0   :  { %1968 = vmatpush1.bf16.msra.mxu1 %v2696_v55  ;;  %v2788_v55 = vld [vmem:[#allocation5 + $0x1c4] ss:$24 sps:$4 sm:$0xff]  }
  0xa1   :  { %1927 = vmatpush1.bf16.msra.mxu0 %v2693_v54  ;;  %1969 = vmatprep.subr.bf16.mxu1 %v2704_v57  ;;  %v2785_v54 = vld [vmem:[#allocation5 + $0x4bc] ss:$24 sps:$4 sm:$0xff]   ;;  %v2786_v57 = vld [vmem:[#allocation5 + $0x1c0] ss:$24 sps:$4 sm:$0xff]  }
  0xa2   :  { %1928 = vmatprep.subr.bf16.mxu0 %v2701_v56  ;;  %v2783_v56 = vld [vmem:[#allocation5 + $0x4b8] ss:$24 sps:$4 sm:$0xff]  }
  0xa4   :  { %1970 = vmatpush1.bf16.msra.mxu1 %v2702_v59  ;;  %v2794_v59 = vld [vmem:[#allocation5 + $0x1f4] ss:$24 sps:$4 sm:$0xff]  }
  0xa5   :  { %1929 = vmatpush1.bf16.msra.mxu0 %v2699_v58  ;;  %1971 = vmatprep.subr.bf16.mxu1 %v2710_v61  ;;  %v2791_v58 = vld [vmem:[#allocation5 + $0x4ec] ss:$24 sps:$4 sm:$0xff]   ;;  %v2792_v61 = vld [vmem:[#allocation5 + $0x1f0] ss:$24 sps:$4 sm:$0xff]  }
  0xa6   :  { %1930 = vmatprep.subr.bf16.mxu0 %v2707_v60  ;;  %v2789_v60 = vld [vmem:[#allocation5 + $0x4e8] ss:$24 sps:$4 sm:$0xff]  }
  0xa8   :  { %1972 = vmatpush1.bf16.msra.mxu1 %v2708_v63  ;;  %v2800_v63 = vld [vmem:[#allocation5 + $0x224] ss:$24 sps:$4 sm:$0xff]  }
  0xa9   :  { %1931 = vmatpush1.bf16.msra.mxu0 %v2705_v62  ;;  %1973 = vmatprep.subr.bf16.mxu1 %v2716_v1  ;;  %v2797_v62 = vld [vmem:[#allocation5 + $0x51c] ss:$24 sps:$4 sm:$0xff]   ;;  %v2798_v1 = vld [vmem:[#allocation5 + $0x220] ss:$24 sps:$4 sm:$0xff]  }
  0xaa   :  { %1932 = vmatprep.subr.bf16.mxu0 %v2713_v0  ;;  %v2795_v0 = vld [vmem:[#allocation5 + $0x518] ss:$24 sps:$4 sm:$0xff]  }
  0xac   :  { %1974 = vmatpush1.bf16.msra.mxu1 %v2714_v3  ;;  %v2806_v3 = vld [vmem:[#allocation5 + $0x254] ss:$24 sps:$4 sm:$0xff]  }
  0xad   :  { %1933 = vmatpush1.bf16.msra.mxu0 %v2711_v2  ;;  %1975 = vmatprep.subr.bf16.mxu1 %v2722_v5  ;;  %v2803_v2 = vld [vmem:[#allocation5 + $0x54c] ss:$24 sps:$4 sm:$0xff]   ;;  %v2804_v5 = vld [vmem:[#allocation5 + $0x250] ss:$24 sps:$4 sm:$0xff]  }
  0xae   :  { %1934 = vmatprep.subr.bf16.mxu0 %v2719_v4  ;;  %v2801_v4 = vld [vmem:[#allocation5 + $0x548] ss:$24 sps:$4 sm:$0xff]  }
  0xb0   :  { %1976 = vmatpush1.bf16.msra.mxu1 %v2720_v7  ;;  %v2812_v7 = vld [vmem:[#allocation5 + $0x284] ss:$24 sps:$4 sm:$0xff]  }
  0xb1   :  { %1935 = vmatpush1.bf16.msra.mxu0 %v2717_v6  ;;  %1977 = vmatprep.subr.bf16.mxu1 %v2728_v9  ;;  %v2809_v6 = vld [vmem:[#allocation5 + $0x57c] ss:$24 sps:$4 sm:$0xff]   ;;  %v2810_v9 = vld [vmem:[#allocation5 + $0x280] ss:$24 sps:$4 sm:$0xff]  }
  0xb2   :  { %1936 = vmatprep.subr.bf16.mxu0 %v2725_v8  ;;  %v2807_v8 = vld [vmem:[#allocation5 + $0x578] ss:$24 sps:$4 sm:$0xff]  }
  0xb4   :  { %1978 = vmatpush1.bf16.msra.mxu1 %v2726_v13  ;;  %v2818_v13 = vld [vmem:[#allocation5 + $0x2b4] ss:$24 sps:$4 sm:$0xff]  }
  0xb5   :  { %1937 = vmatpush1.bf16.msra.mxu0 %v2723_v12  ;;  %1988 = vmatprep.subr.bf16.mxu1 %v2731_v15  ;;  %v2815_v12 = vld [vmem:[#allocation5 + $0x5ac] ss:$24 sps:$4 sm:$0xff]   ;;  %v2816_v15 = vld [vmem:[#allocation5 + $0x2b0] ss:$24 sps:$4 sm:$0xff]  }
  0xb6   :  { %2070 = vmatprep.subr.bf16.mxu0 %v2734_v16  ;;  %v2821_v16 = vld [vmem:[#allocation5 + $0x5dc] ss:$24 sps:$4 sm:$0xff]  }
  0xb7   :  { %1980 = vmatmul.mubr.bf16.vlgmr.msra.gmra.mrb[4].mxu1 %v3131_v10 }
  0xb8   :  { %1939 = vmatmul.mubr.bf16.vlgmr.msra.gmra.mrb[0].mxu0 %v3141_v17  ;;  %1989 = vmatpush1.bf16.msra.mxu1 %v2729_v18  ;;  %v2824_v18 = vld [vmem:[#allocation5 + $0x2e4] ss:$24 sps:$4 sm:$0xff]  }
  0xb9   :  { %2071 = vmatpush1.bf16.msra.mxu0 %v2732_v19  ;;  %1990 = vmatprep.subr.bf16.mxu1 %v2737_v20  ;;  %v2819_v19 = vld [vmem:[#allocation5 + $0x5d8] ss:$24 sps:$4 sm:$0xff]  }
  0xba   :  { %2072 = vmatprep.subr.bf16.mxu0 %v2740_v21  ;;  %2020 = vmatprep.mubr.bf16.mxu1 %v3127_v51  ;;  %v2822_v20 = vld [vmem:[#allocation5 + $0x2e0] ss:$24 sps:$4 sm:$0xff]   ;;  %v2827_v21 = vld [vmem:[#allocation5 + $0x60c] ss:$24 sps:$4 sm:$0xff]  }
  0xbb   :  { %2102 = vmatprep.mubr.bf16.mxu0 %v3125_v47  ;;  %v2756_v47 = vld [vmem:[#allocation5 + $0xd0] ss:$24 sps:$4 sm:$0xff]  }
  0xbc   :  { %1991 = vmatpush1.bf16.msra.mxu1 %v2735_v22  ;;  %v2830_v22 = vld [vmem:[#allocation5 + $0x314] ss:$24 sps:$4 sm:$0xff]  }
  0xbd   :  { %2073 = vmatpush1.bf16.msra.mxu0 %v2738_v23  ;;  %1992 = vmatprep.subr.bf16.mxu1 %v2743_v24  ;;  %v2825_v23 = vld [vmem:[#allocation5 + $0x608] ss:$24 sps:$4 sm:$0xff]  }
  0xbe   :  { %2074 = vmatprep.subr.bf16.mxu0 %v2746_v25  ;;  %v2828_v24 = vld [vmem:[#allocation5 + $0x310] ss:$24 sps:$4 sm:$0xff]   ;;  %v2833_v25 = vld [vmem:[#allocation5 + $0x63c] ss:$24 sps:$4 sm:$0xff]  }
  0xc0   :  { %1993 = vmatpush1.bf16.msra.mxu1 %v2741_v26  ;;  %v2836_v26 = vld [vmem:[#allocation5 + $0x344] ss:$24 sps:$4 sm:$0xff]  }
  0xc1   :  { %2075 = vmatpush1.bf16.msra.mxu0 %v2744_v27  ;;  %1994 = vmatprep.subr.bf16.mxu1 %v2749_v28  ;;  %v2831_v27 = vld [vmem:[#allocation5 + $0x638] ss:$24 sps:$4 sm:$0xff]  }
  0xc2   :  { %2076 = vmatprep.subr.bf16.mxu0 %v2752_v29  ;;  %v2834_v28 = vld [vmem:[#allocation5 + $0x340] ss:$24 sps:$4 sm:$0xff]   ;;  %v2839_v29 = vld [vmem:[#allocation5 + $0x66c] ss:$24 sps:$4 sm:$0xff]  }
  0xc4   :  { %1995 = vmatpush1.bf16.msra.mxu1 %v2747_v30  ;;  %v2842_v30 = vld [vmem:[#allocation5 + $0x374] ss:$24 sps:$4 sm:$0xff]  }
  0xc5   :  { %2077 = vmatpush1.bf16.msra.mxu0 %v2750_v31  ;;  %1996 = vmatprep.subr.bf16.mxu1 %v2755_v32  ;;  %v2837_v31 = vld [vmem:[#allocation5 + $0x668] ss:$24 sps:$4 sm:$0xff]  }
  0xc6   :  { %2078 = vmatprep.subr.bf16.mxu0 %v2758_v33  ;;  %v2840_v32 = vld [vmem:[#allocation5 + $0x370] ss:$24 sps:$4 sm:$0xff]   ;;  %v2845_v33 = vld [vmem:[#allocation5 + $0x69c] ss:$24 sps:$4 sm:$0xff]  }
  0xc8   :  { %1997 = vmatpush1.bf16.msra.mxu1 %v2753_v34  ;;  %v2843_v34 = vld [vmem:[#allocation5 + $0x698] ss:$24 sps:$4 sm:$0xff]  }
  0xc9   :  { %2079 = vmatpush1.bf16.msra.mxu0 %v2756_v47  ;;  %1998 = vmatprep.subr.bf16.mxu1 %v2761_v36  ;;  %v2846_v47 = vld [vmem:[#allocation5 + $0x3a0] ss:$24 sps:$4 sm:$0xff]   ;;  %v2851_v36 = vld [vmem:[#allocation5 + $0x6cc] ss:$24 sps:$4 sm:$0xff]  }
  0xca   :  { %2080 = vmatprep.subr.bf16.mxu0 %v2764_v37  ;;  %v2854_v37 = vld [vmem:[#allocation5 + $0x3d4] ss:$24 sps:$4 sm:$0xff]  }
  0xcc   :  { %1999 = vmatpush1.bf16.msra.mxu1 %v2759_v38  ;;  %v2849_v38 = vld [vmem:[#allocation5 + $0x6c8] ss:$24 sps:$4 sm:$0xff]  }
  0xcd   :  { %2081 = vmatpush1.bf16.msra.mxu0 %v2762_v39  ;;  %2000 = vmatprep.subr.bf16.mxu1 %v2767_v40  ;;  %v2857_v39 = vld [vmem:[#allocation5 + $0x6fc] ss:$24 sps:$4 sm:$0xff]  }
  0xce   :  { %2082 = vmatprep.subr.bf16.mxu0 %v2770_v41  ;;  %v2860_v40 = vld [vmem:[#allocation5 + $0x404] ss:$24 sps:$4 sm:$0xff]   ;;  %v2855_v41 = vld [vmem:[#allocation5 + $0x6f8] ss:$24 sps:$4 sm:$0xff]  }
  0xd0   :  { %2001 = vmatpush1.bf16.msra.mxu1 %v2765_v42  ;;  %v2858_v42 = vld [vmem:[#allocation5 + $0x400] ss:$24 sps:$4 sm:$0xff]  }
  0xd1   :  { %2083 = vmatpush1.bf16.msra.mxu0 %v2768_v43  ;;  %2002 = vmatprep.subr.bf16.mxu1 %v2773_v44  ;;  %v2863_v43 = vld [vmem:[#allocation5 + $0x72c] ss:$24 sps:$4 sm:$0xff]  }
  0xd2   :  { %2084 = vmatprep.subr.bf16.mxu0 %v2776_v45  ;;  %v2866_v44 = vld [vmem:[#allocation5 + $0x434] ss:$24 sps:$4 sm:$0xff]   ;;  %v2861_v45 = vld [vmem:[#allocation5 + $0x728] ss:$24 sps:$4 sm:$0xff]  }
  0xd4   :  { %2003 = vmatpush1.bf16.msra.mxu1 %v2771_v46  ;;  %v2864_v46 = vld [vmem:[#allocation5 + $0x430] ss:$24 sps:$4 sm:$0xff]  }
  0xd5   :  { %2085 = vmatpush1.bf16.msra.mxu0 %v2774_v48  ;;  %2004 = vmatprep.subr.bf16.mxu1 %v2779_v49  ;;  %v2869_v48 = vld [vmem:[#allocation5 + $0x75c] ss:$24 sps:$4 sm:$0xff]  }
  0xd6   :  { %2086 = vmatprep.subr.bf16.mxu0 %v2782_v50  ;;  %v2872_v49 = vld [vmem:[#allocation5 + $0x464] ss:$24 sps:$4 sm:$0xff]   ;;  %v2867_v50 = vld [vmem:[#allocation5 + $0x758] ss:$24 sps:$4 sm:$0xff]  }
  0xd8   :  { %2005 = vmatpush1.bf16.msra.mxu1 %v2777_v52  ;;  %v2870_v52 = vld [vmem:[#allocation5 + $0x460] ss:$24 sps:$4 sm:$0xff]  }
  0xd9   :  { %2087 = vmatpush1.bf16.msra.mxu0 %v2780_v53  ;;  %2006 = vmatprep.subr.bf16.mxu1 %v2785_v54  ;;  %v2875_v53 = vld [vmem:[#allocation5 + $0x78c] ss:$24 sps:$4 sm:$0xff]  }
  0xda   :  { %2088 = vmatprep.subr.bf16.mxu0 %v2788_v55  ;;  %v2878_v54 = vld [vmem:[#allocation5 + $0x494] ss:$24 sps:$4 sm:$0xff]   ;;  %v2873_v55 = vld [vmem:[#allocation5 + $0x788] ss:$24 sps:$4 sm:$0xff]  }
  0xdc   :  { %2007 = vmatpush1.bf16.msra.mxu1 %v2783_v56  ;;  %v2876_v56 = vld [vmem:[#allocation5 + $0x490] ss:$24 sps:$4 sm:$0xff]  }
  0xdd   :  { %2089 = vmatpush1.bf16.msra.mxu0 %v2786_v57  ;;  %2008 = vmatprep.subr.bf16.mxu1 %v2791_v58  ;;  %v2881_v57 = vld [vmem:[#allocation5 + $0x7bc] ss:$24 sps:$4 sm:$0xff]  }
  0xde   :  { %2090 = vmatprep.subr.bf16.mxu0 %v2794_v59  ;;  %v2884_v58 = vld [vmem:[#allocation5 + $0x4c4] ss:$24 sps:$4 sm:$0xff]   ;;  %v2879_v59 = vld [vmem:[#allocation5 + $0x7b8] ss:$24 sps:$4 sm:$0xff]  }
  0xe0   :  { %2009 = vmatpush1.bf16.msra.mxu1 %v2789_v60  ;;  %v2882_v60 = vld [vmem:[#allocation5 + $0x4c0] ss:$24 sps:$4 sm:$0xff]  }
  0xe1   :  { %2091 = vmatpush1.bf16.msra.mxu0 %v2792_v61  ;;  %2010 = vmatprep.subr.bf16.mxu1 %v2797_v62  ;;  %v2887_v61 = vld [vmem:[#allocation5 + $0x7ec] ss:$24 sps:$4 sm:$0xff]  }
  0xe2   :  { %2092 = vmatprep.subr.bf16.mxu0 %v2800_v63  ;;  %v2890_v62 = vld [vmem:[#allocation5 + $0x4f4] ss:$24 sps:$4 sm:$0xff]   ;;  %v2885_v63 = vld [vmem:[#allocation5 + $0x7e8] ss:$24 sps:$4 sm:$0xff]  }
  0xe4   :  { %2011 = vmatpush1.bf16.msra.mxu1 %v2795_v0  ;;  %v2888_v0 = vld [vmem:[#allocation5 + $0x4f0] ss:$24 sps:$4 sm:$0xff]  }
  0xe5   :  { %2093 = vmatpush1.bf16.msra.mxu0 %v2798_v1  ;;  %2012 = vmatprep.subr.bf16.mxu1 %v2803_v2  ;;  %v2893_v1 = vld [vmem:[#allocation5 + $0x81c] ss:$24 sps:$4 sm:$0xff]  }
  0xe6   :  { %2094 = vmatprep.subr.bf16.mxu0 %v2806_v3  ;;  %v2896_v2 = vld [vmem:[#allocation5 + $0x524] ss:$24 sps:$4 sm:$0xff]   ;;  %v2891_v3 = vld [vmem:[#allocation5 + $0x818] ss:$24 sps:$4 sm:$0xff]  }
  0xe8   :  { %2013 = vmatpush1.bf16.msra.mxu1 %v2801_v4  ;;  %v2894_v4 = vld [vmem:[#allocation5 + $0x520] ss:$24 sps:$4 sm:$0xff]  }
  0xe9   :  { %2095 = vmatpush1.bf16.msra.mxu0 %v2804_v5  ;;  %2014 = vmatprep.subr.bf16.mxu1 %v2809_v6  ;;  %v2899_v5 = vld [vmem:[#allocation5 + $0x84c] ss:$24 sps:$4 sm:$0xff]  }
  0xea   :  { %2096 = vmatprep.subr.bf16.mxu0 %v2812_v7  ;;  %v2902_v6 = vld [vmem:[#allocation5 + $0x554] ss:$24 sps:$4 sm:$0xff]   ;;  %v2897_v7 = vld [vmem:[#allocation5 + $0x848] ss:$24 sps:$4 sm:$0xff]  }
  0xec   :  { %2015 = vmatpush1.bf16.msra.mxu1 %v2807_v8  ;;  %v2900_v8 = vld [vmem:[#allocation5 + $0x550] ss:$24 sps:$4 sm:$0xff]  }
  0xed   :  { %2097 = vmatpush1.bf16.msra.mxu0 %v2810_v9  ;;  %2016 = vmatprep.subr.bf16.mxu1 %v2815_v12  ;;  %v2905_v9 = vld [vmem:[#allocation5 + $0x87c] ss:$24 sps:$4 sm:$0xff]  }
  0xee   :  { %2098 = vmatprep.subr.bf16.mxu0 %v2818_v13  ;;  %v2908_v12 = vld [vmem:[#allocation5 + $0x584] ss:$24 sps:$4 sm:$0xff]   ;;  %v2903_v13 = vld [vmem:[#allocation5 + $0x878] ss:$24 sps:$4 sm:$0xff]  }
  0xf0   :  { %2017 = vmatpush1.bf16.msra.mxu1 %v2813_v14  ;;  %v2906_v14 = vld [vmem:[#allocation5 + $0x580] ss:$24 sps:$4 sm:$0xff]  }
  0xf1   :  { %2099 = vmatpush1.bf16.msra.mxu0 %v2816_v15  ;;  %2018 = vmatprep.subr.bf16.mxu1 %v2821_v16  ;;  %v2911_v15 = vld [vmem:[#allocation5 + $0x8ac] ss:$24 sps:$4 sm:$0xff]  }
  0xf2   :  { %2100 = vmatprep.subr.bf16.mxu0 %v2824_v18  ;;  %v2914_v16 = vld [vmem:[#allocation5 + $0x5b4] ss:$24 sps:$4 sm:$0xff]   ;;  %v2909_v18 = vld [vmem:[#allocation5 + $0x8a8] ss:$24 sps:$4 sm:$0xff]  }
  0xf4   :  { %2019 = vmatpush1.bf16.msra.mxu1 %v2819_v19  ;;  %v2912_v19 = vld [vmem:[#allocation5 + $0x5b0] ss:$24 sps:$4 sm:$0xff]  }
  0xf5   :  { %2101 = vmatpush1.bf16.msra.mxu0 %v2822_v20  ;;  %2029 = vmatprep.subr.bf16.mxu1 %v2827_v21  ;;  %v2917_v20 = vld [vmem:[#allocation5 + $0x8dc] ss:$24 sps:$4 sm:$0xff]  }
  0xf6   :  { %2111 = vmatprep.subr.bf16.mxu0 %v2830_v22  ;;  %v2920_v21 = vld [vmem:[#allocation5 + $0x5e4] ss:$24 sps:$4 sm:$0xff]   ;;  %v2915_v22 = vld [vmem:[#allocation5 + $0x8d8] ss:$24 sps:$4 sm:$0xff]  }
  0xf7   :  { %2021 = vmatmul.mubr.bf16.vlgmr.msra.gmra.mrb[4].mxu1 %v3133_v11 }
  0xf8   :  { %2103 = vmatmul.mubr.bf16.vlgmr.msra.gmra.mrb[4].mxu0 %v3131_v10  ;;  %2030 = vmatpush1.bf16.msra.mxu1 %v2825_v23  ;;  %v2848_v10 = vld [vmem:[#allocation5 + $0x3a4] ss:$24 sps:$4 sm:$0xff]   ;;  %v2918_v23 = vld [vmem:[#allocation5 + $0x5e0] ss:$24 sps:$4 sm:$0xff]  }
  0xf9   :  { %2112 = vmatpush1.bf16.msra.mxu0 %v2828_v24  ;;  %2031 = vmatprep.subr.bf16.mxu1 %v2833_v25  ;;  %v2923_v24 = vld [vmem:[#allocation5 + $0x614] ss:$24 sps:$4 sm:$0xff]   ;;  %v2921_v25 = vld [vmem:[#allocation5 + $0x610] ss:$24 sps:$4 sm:$0xff]  }
  0xfa   :  { %2113 = vmatprep.subr.bf16.mxu0 %v2836_v26  ;;  %2061 = vmatprep.mubr.bf16.mxu1 %v3138_v35  ;;  %v2926_v26 = vld [vmem:[#allocation5 + $0x644] ss:$24 sps:$4 sm:$0xff]  }
  0xfb   :  { %2143 = vmatprep.mubr.bf16.mxu0 %v3127_v51  ;;  %v2852_v51 = vld [vmem:[#allocation5 + $0x3d0] ss:$24 sps:$4 sm:$0xff]  }
  0xfc   :  { %2032 = vmatpush1.bf16.msra.mxu1 %v2831_v27  ;;  %v2924_v27 = vld [vmem:[#allocation5 + $0x640] ss:$24 sps:$4 sm:$0xff]  }
  0xfd   :  { %2114 = vmatpush1.bf16.msra.mxu0 %v2834_v28  ;;  %2033 = vmatprep.subr.bf16.mxu1 %v2839_v29  ;;  %v2929_v28 = vld [vmem:[#allocation5 + $0x674] ss:$24 sps:$4 sm:$0xff]   ;;  %v2927_v29 = vld [vmem:[#allocation5 + $0x670] ss:$24 sps:$4 sm:$0xff]  }
  0xfe   :  { %2115 = vmatprep.subr.bf16.mxu0 %v2842_v30  ;;  %v2932_v30 = vld [vmem:[#allocation5 + $0x6a4] ss:$24 sps:$4 sm:$0xff]  }
 0x100   :  { %2034 = vmatpush1.bf16.msra.mxu1 %v2837_v31  ;;  %v2930_v31 = vld [vmem:[#allocation5 + $0x6a0] ss:$24 sps:$4 sm:$0xff]  }
 0x101   :  { %2116 = vmatpush1.bf16.msra.mxu0 %v2840_v32  ;;  %2035 = vmatprep.subr.bf16.mxu1 %v2845_v33  ;;  %v2935_v32 = vld [vmem:[#allocation5 + $0x6d4] ss:$24 sps:$4 sm:$0xff]   ;;  %v2933_v33 = vld [vmem:[#allocation5 + $0x6d0] ss:$24 sps:$4 sm:$0xff]  }
 0x102   :  { %2117 = vmatprep.subr.bf16.mxu0 %v2848_v10  ;;  %v2938_v10 = vld [vmem:[#allocation5 + $0x704] ss:$24 sps:$4 sm:$0xff]  }
 0x104   :  { %2036 = vmatpush1.bf16.msra.mxu1 %v2843_v34  ;;  %v2941_v34 = vld [vmem:[#allocation5 + $0x734] ss:$24 sps:$4 sm:$0xff]  }
 0x105   :  { %2118 = vmatpush1.bf16.msra.mxu0 %v2846_v47  ;;  %2037 = vmatprep.subr.bf16.mxu1 %v2851_v36  ;;  %v2939_v36 = vld [vmem:[#allocation5 + $0x730] ss:$24 sps:$4 sm:$0xff]  }
 0x106   :  { %2119 = vmatprep.subr.bf16.mxu0 %v2854_v37 }
 0x108   :  { %2038 = vmatpush1.bf16.msra.mxu1 %v2849_v38  ;;  %v2944_v38 = vld [vmem:[#allocation5 + $0x764] ss:$24 sps:$4 sm:$0xff]  }
 0x109   :  { %2120 = vmatpush1.bf16.msra.mxu0 %v2852_v51  ;;  %2039 = vmatprep.subr.bf16.mxu1 %v2857_v39  ;;  %v2942_v39 = vld [vmem:[#allocation5 + $0x760] ss:$24 sps:$4 sm:$0xff]  }
 0x10a   :  { %2121 = vmatprep.subr.bf16.mxu0 %v2860_v40  ;;  %v2947_v40 = vld [vmem:[#allocation5 + $0x794] ss:$24 sps:$4 sm:$0xff]  }
 0x10c   :  { %2040 = vmatpush1.bf16.msra.mxu1 %v2855_v41  ;;  %v2945_v41 = vld [vmem:[#allocation5 + $0x790] ss:$24 sps:$4 sm:$0xff]  }
 0x10d   :  { %2122 = vmatpush1.bf16.msra.mxu0 %v2858_v42  ;;  %2041 = vmatprep.subr.bf16.mxu1 %v2863_v43  ;;  %v2950_v42 = vld [vmem:[#allocation5 + $0x7c4] ss:$24 sps:$4 sm:$0xff]   ;;  %v2948_v43 = vld [vmem:[#allocation5 + $0x7c0] ss:$24 sps:$4 sm:$0xff]  }
 0x10e   :  { %2123 = vmatprep.subr.bf16.mxu0 %v2866_v44  ;;  %v2953_v44 = vld [vmem:[#allocation5 + $0x7f4] ss:$24 sps:$4 sm:$0xff]  }
 0x110   :  { %2042 = vmatpush1.bf16.msra.mxu1 %v2861_v45  ;;  %v2951_v45 = vld [vmem:[#allocation5 + $0x7f0] ss:$24 sps:$4 sm:$0xff]  }
 0x111   :  { %2124 = vmatpush1.bf16.msra.mxu0 %v2864_v46  ;;  %2043 = vmatprep.subr.bf16.mxu1 %v2869_v48  ;;  %v2956_v46 = vld [vmem:[#allocation5 + $0x824] ss:$24 sps:$4 sm:$0xff]   ;;  %v2954_v48 = vld [vmem:[#allocation5 + $0x820] ss:$24 sps:$4 sm:$0xff]  }
 0x112   :  { %2125 = vmatprep.subr.bf16.mxu0 %v2872_v49  ;;  %v2959_v49 = vld [vmem:[#allocation5 + $0x854] ss:$24 sps:$4 sm:$0xff]  }
 0x114   :  { %2044 = vmatpush1.bf16.msra.mxu1 %v2867_v50  ;;  %v2957_v50 = vld [vmem:[#allocation5 + $0x850] ss:$24 sps:$4 sm:$0xff]  }
 0x115   :  { %2126 = vmatpush1.bf16.msra.mxu0 %v2870_v52  ;;  %2045 = vmatprep.subr.bf16.mxu1 %v2875_v53  ;;  %v2962_v52 = vld [vmem:[#allocation5 + $0x884] ss:$24 sps:$4 sm:$0xff]   ;;  %v2960_v53 = vld [vmem:[#allocation5 + $0x880] ss:$24 sps:$4 sm:$0xff]  }
 0x116   :  { %2127 = vmatprep.subr.bf16.mxu0 %v2878_v54  ;;  %v2965_v54 = vld [vmem:[#allocation5 + $0x8b4] ss:$24 sps:$4 sm:$0xff]  }
 0x118   :  { %2046 = vmatpush1.bf16.msra.mxu1 %v2873_v55  ;;  %v2963_v55 = vld [vmem:[#allocation5 + $0x8b0] ss:$24 sps:$4 sm:$0xff]  }
 0x119   :  { %2128 = vmatpush1.bf16.msra.mxu0 %v2876_v56  ;;  %2047 = vmatprep.subr.bf16.mxu1 %v2881_v57  ;;  %v2968_v56 = vld [vmem:[#allocation5 + $0x8e4] ss:$24 sps:$4 sm:$0xff]   ;;  %v2966_v57 = vld [vmem:[#allocation5 + $0x8e0] ss:$24 sps:$4 sm:$0xff]  }
 0x11a   :  { %2129 = vmatprep.subr.bf16.mxu0 %v2884_v58  ;;  %v354_v58 = vlaneseq }
 0x11c   :  { %2048 = vmatpush1.bf16.msra.mxu1 %v2879_v59  ;;  %v355_v59 = vshrl.u32 %v354_v58, 7 }
 0x11d   :  { %2130 = vmatpush1.bf16.msra.mxu0 %v2882_v60  ;;  %2049 = vmatprep.subr.bf16.mxu1 %v2887_v61  ;;  %v352_v61 = vld [vmem:[#allocation7] sm:$0x3f] }
 0x11e   :  { %2131 = vmatprep.subr.bf16.mxu0 %v2890_v62  ;;  %v356_v60 = vsub.s32 0, %v355_v59  ;;  %v360_v62 = vsub.s32 1, %v355_v59 }
 0x120   :  { %2050 = vmatpush1.bf16.msra.mxu1 %v2885_v63  ;;  %v357_v63 = vrot.slane %v352_v61, %v356_v60 }
 0x121   :  { %2132 = vmatpush1.bf16.msra.mxu0 %v2888_v0  ;;  %2051 = vmatprep.subr.bf16.mxu1 %v2893_v1  ;;  %v361_v0 = vrot.slane %v352_v61, %v360_v62 }
 0x122   :  { %2133 = vmatprep.subr.bf16.mxu0 %v2896_v2 }
 0x124   :  { %2052 = vmatpush1.bf16.msra.mxu1 %v2891_v3 }
 0x125   :  { %2134 = vmatpush1.bf16.msra.mxu0 %v2894_v4  ;;  %2053 = vmatprep.subr.bf16.mxu1 %v2899_v5 }
 0x126   :  { %2135 = vmatprep.subr.bf16.mxu0 %v2902_v6 }
 0x128   :  { %2054 = vmatpush1.bf16.msra.mxu1 %v2897_v7 }
 0x129   :  { %2136 = vmatpush1.bf16.msra.mxu0 %v2900_v8  ;;  %2055 = vmatprep.subr.bf16.mxu1 %v2905_v9  ;;  %v364_v9 = vsub.s32 2, %v355_v59 }
 0x12a   :  { %2137 = vmatprep.subr.bf16.mxu0 %v2908_v12  ;;  %v368_v12 = vsub.s32 3, %v355_v59 }
 0x12c   :  { %2056 = vmatpush1.bf16.msra.mxu1 %v2903_v13  ;;  %v369_v13 = vrot.slane %v352_v61, %v368_v12 }
 0x12d   :  { %2138 = vmatpush1.bf16.msra.mxu0 %v2906_v14  ;;  %2057 = vmatprep.subr.bf16.mxu1 %v2911_v15 }
 0x12e   :  { %2139 = vmatprep.subr.bf16.mxu0 %v2914_v16 }
 0x130   :  { %2058 = vmatpush1.bf16.msra.mxu1 %v2909_v18 }
 0x131   :  { %2140 = vmatpush1.bf16.msra.mxu0 %v2912_v19  ;;  %2059 = vmatprep.subr.bf16.mxu1 %v2917_v20 }
 0x132   :  { %2141 = vmatprep.subr.bf16.mxu0 %v2920_v21  ;;  %v372_v21 = vsub.s32 4, %v355_v59 }
 0x134   :  { %2060 = vmatpush1.bf16.msra.mxu1 %v2915_v22  ;;  %v376_v22 = vsub.s32 5, %v355_v59 }
 0x135   :  { %2142 = vmatpush1.bf16.msra.mxu0 %v2918_v23  ;;  %v373_v23 = vrot.slane %v352_v61, %v372_v21 }
 0x136   :  { %2152 = vmatprep.subr.bf16.mxu0 %v2923_v24  ;;  %v377_v24 = vrot.slane %v352_v61, %v376_v22 }
 0x137   :  { %2062 = vmatmul.mubr.bf16.vlgmr.msra.gmra.mrb[4].mxu1 %v3141_v17 }
 0x138   :  { %2144 = vmatmul.mubr.bf16.vlgmr.msra.gmra.mrb[4].mxu0 %v3133_v11  ;;  %v2936_v11 = vld [vmem:[#allocation5 + $0x700] ss:$24 sps:$4 sm:$0xff]  }
 0x139   :  { %2153 = vmatpush1.bf16.msra.mxu0 %v2921_v25  ;;  %2184 = vmatprep.mubr.bf16.mxu0 %v3138_v35 }
 0x13a   :  { %2154 = vmatprep.subr.bf16.mxu0 %v2926_v26 }
 0x13d   :  { %2155 = vmatpush1.bf16.msra.mxu0 %v2924_v27 }
 0x13e   :  { %2156 = vmatprep.subr.bf16.mxu0 %v2929_v28 }
 0x141   :  { %2157 = vmatpush1.bf16.msra.mxu0 %v2927_v29 }
 0x142   :  { %2158 = vmatprep.subr.bf16.mxu0 %v2932_v30 }
 0x145   :  { %2159 = vmatpush1.bf16.msra.mxu0 %v2930_v31 }
 0x146   :  { %2160 = vmatprep.subr.bf16.mxu0 %v2935_v32 }
 0x149   :  { %2161 = vmatpush1.bf16.msra.mxu0 %v2933_v33 }
 0x14a   :  { %2162 = vmatprep.subr.bf16.mxu0 %v2938_v10  ;;  %v1858_v47 = vpop.f32.mrb[0].mxu1 }
 0x14b   :  { %v1860_v35 = vpop.f32.mrb[1].mxu1  ;;  %v1859_v1 = vadd.f32 %v1858_v47, %v357_v63 }
 0x14c   :  { %v1862_v37 = vpop.f32.mrb[2].mxu1  ;;  %v1861_v2 = vadd.f32 %v1860_v35, %v361_v0 }
 0x14d   :  { %2163 = vmatpush1.bf16.msra.mxu0 %v2936_v11  ;;  %v1863_v51 = vpop.f32.mrb[3].mxu1 }
 0x14e   :  { %2164 = vmatprep.subr.bf16.mxu0 %v2941_v34 }
 0x151   :  { %2165 = vmatpush1.bf16.msra.mxu0 %v2939_v36 }
 0x152   :  { %2166 = vmatprep.subr.bf16.mxu0 %v2944_v38 }
 0x155   :  { %2167 = vmatpush1.bf16.msra.mxu0 %v2942_v39 }
 0x156   :  { %2168 = vmatprep.subr.bf16.mxu0 %v2947_v40 }
 0x159   :  { %2169 = vmatpush1.bf16.msra.mxu0 %v2945_v41 }
 0x15a   :  { %2170 = vmatprep.subr.bf16.mxu0 %v2950_v42 }
 0x15d   :  { %2171 = vmatpush1.bf16.msra.mxu0 %v2948_v43 }
 0x15e   :  { %2172 = vmatprep.subr.bf16.mxu0 %v2953_v44 }
 0x161   :  { %2173 = vmatpush1.bf16.msra.mxu0 %v2951_v45 }
 0x162   :  { %2174 = vmatprep.subr.bf16.mxu0 %v2956_v46 }
 0x165   :  { %2175 = vmatpush1.bf16.msra.mxu0 %v2954_v48 }
 0x166   :  { %2176 = vmatprep.subr.bf16.mxu0 %v2959_v49 }
 0x169   :  { %2177 = vmatpush1.bf16.msra.mxu0 %v2957_v50 }
 0x16a   :  { %2178 = vmatprep.subr.bf16.mxu0 %v2962_v52 }
 0x16d   :  { %2179 = vmatpush1.bf16.msra.mxu0 %v2960_v53 }
 0x16e   :  { %2180 = vmatprep.subr.bf16.mxu0 %v2965_v54 }
 0x171   :  { %2181 = vmatpush1.bf16.msra.mxu0 %v2963_v55 }
 0x172   :  { %2182 = vmatprep.subr.bf16.mxu0 %v2968_v56 }
 0x175   :  { %2183 = vmatpush1.bf16.msra.mxu0 %v2966_v57 }
 0x178   :  { %2185 = vmatmul.mubr.bf16.vlgmr.msra.gmra.mrb[4].mxu0 %v3141_v17  ;;  %v365_v17 = vrot.slane %v352_v61, %v364_v9 }
 0x18b   :  { %v1940_v3 = vpop.f32.mrb[0].mxu0 }
 0x18c   :  { %v2504_v4 = vadd.f32 %v1940_v3, %v1859_v1  ;;  %v1942_v5 = vpop.f32.mrb[1].mxu0 }
 0x18d   :  { %v2506_v6 = vadd.f32 %v1942_v5, %v1861_v2  ;;  %v1944_v7 = vpop.f32.mrb[2].mxu0 }
 0x18e   :  { %2193 = vst [vmem:[#allocation8] sm:$0xff] %v2504_v4  ;;  %v1945_v8 = vpop.f32.mrb[3].mxu0 }
 0x18f   :  { %2194 = vst [vmem:[#allocation8 + $0x8] sm:$0xff] %v2506_v6 }
 0x20a   :  { %v2063_v14 = vpop.f32.mrb[4].mxu1 }
 0x20b   :  { %v2507_v15 = vadd.f32 %v2063_v14, %v365_v17  ;;  %v2065_v16 = vpop.f32.mrb[5].mxu1 }
 0x20c   :  { %v2508_v18 = vadd.f32 %v2065_v16, %v369_v13  ;;  %v2067_v19 = vpop.f32.mrb[6].mxu1 }
 0x20d   :  { %2195 = vst [vmem:[#allocation8 + $0x10] sm:$0xff] %v2507_v15  ;;  %v2068_v20 = vpop.f32.mrb[7].mxu1 }
 0x20e   :  { %2196 = vst [vmem:[#allocation8 + $0x18] sm:$0xff] %v2508_v18 }
 0x24b   :  { %v2186_v25 = vpop.f32.mrb[4].mxu0 }
 0x24c   :  { %v2509_v26 = vadd.f32 %v2186_v25, %v373_v23  ;;  %v2188_v27 = vpop.f32.mrb[5].mxu0 }
 0x24d   :  { %v2510_v28 = vadd.f32 %v2188_v27, %v377_v24  ;;  %v2190_v29 = vpop.f32.mrb[6].mxu0 }
 0x24e   :  { %2197 = vst [vmem:[#allocation8 + $0x20] sm:$0xff] %v2509_v26  ;;  %v2191_v30 = vpop.f32.mrb[7].mxu0 }
 0x24f   :  { %2198 = vst [vmem:[#allocation8 + $0x28] sm:$0xff] %v2510_v28 }
 0x250   :  { %3046 = shalt.err (!%p3043_p0)
}
 0x251   :  { %s3047_s25 = scalar_lea.hbm %s3170_s3, 768 }
 0x252   :  { %p3048_p1 = scmp.ne.s32.totalorder %s3170_s3, %s3047_s25  ;;  %p3051_p2 = scmp.lt.u32.totalorder %s3047_s25, %s3170_s3 }
 0x254   :  { %p3053_p3 = pnand %p3051_p2, %p3048_p1 }
 0x256   :  { %3056 = shalt.err (!%p3053_p3)
}
 0x257   :  { %2208 = dma.vmem_to_hbm [thread:$0]  %s2206_s21, 768, %s3170_s3, [#allocation4]  }
 0x258   :  { %3061 = dma.done.wait [#allocation4], 768  }
 0x259   :  { %3062 = vsyncadd [#allocation4], 4294966528 }
 0x25a   :  { %2212 = vsyncpa [#allocation3], 1 }
 0x25b   :  { %2213 = vsyncpa [#allocation6], 1 }
 0x25c   :  { %2214 = vsyncpa [#allocation4], 1 }

</bundles_post_ra>
